<compile_context>
chip_gen: v6e
topology: v6e:2x2x1
jax: 0.10.0
libtpu: 0.0.40
codegen_flags: <defaults>
</compile_context>

<pallas_src>
import math

import jax
import jax.numpy as jnp
from jax.experimental import pallas as pl
from jax.experimental.pallas import tpu as pltpu


# ---------------------------------------------------------------------------
# Small helpers
# ---------------------------------------------------------------------------
def _round_up(a, b):
    return (a + b - 1) // b * b


def _pad_to(a, shape, dtype):
    out = jnp.zeros(shape, dtype)
    return out.at[tuple(slice(0, s) for s in a.shape)].set(a.astype(dtype))


def _largest_tile(n_pad, candidates=(2048, 1024, 512, 256, 128)):
    for c in candidates:
        if n_pad % c == 0:
            return c
    return n_pad


def _agg_row_tile(n_pad):
    # Largest tile <= 512 dividing n_pad, keeping >= 2 row tiles when possible
    # (v7x shards the "parallel" axis over its 2 TensorCores).
    for c in (512, 256, 128):
        if n_pad % c == 0 and n_pad // c >= 2:
            return c
    return 128 if n_pad % 128 == 0 else n_pad


def _vmem_limit(need_bytes):
    # Raise v5e's 16 MiB default; cap well inside v7x's 64 MiB physical VMEM.
    return int(min(max(2 * need_bytes, 24 << 20), 48 << 20))


# ---------------------------------------------------------------------------
# Kernels
# ---------------------------------------------------------------------------
def _fused_small_kernel(x_ref, adj_ref, w1_ref, b1_ref, w2_ref, b2_ref, o_ref):
    """Whole forward pass with adj resident in VMEM (small graphs)."""
    adj = adj_ref[...]
    s1 = jnp.dot(x_ref[...], w1_ref[...], preferred_element_type=jnp.float32)
    h = jnp.maximum(
        jnp.dot(adj, s1.astype(jnp.bfloat16), preferred_element_type=jnp.float32)
        + b1_ref[...], 0.0)
    # TODO(synk): dropout (training mode) not reproduced -> identity.
    s2 = jnp.dot(h.astype(jnp.bfloat16), w2_ref[...],
                 preferred_element_type=jnp.float32)
    out = jnp.maximum(
        jnp.dot(adj, s2.astype(jnp.bfloat16), preferred_element_type=jnp.float32)
        + b2_ref[...], 0.0)
    o_ref[...] = out.astype(o_ref.dtype)


def _support_kernel(x_ref, w_ref, s_ref):
    """support = x @ W   (bf16 operands, f32 MXU accumulation, bf16 store)."""
    s_ref[...] = jnp.dot(
        x_ref[...], w_ref[...], preferred_element_type=jnp.float32
    ).astype(s_ref.dtype)


def _make_aggregate_kernel(tk, support_resident, fuse_w2):
    """out = relu(adj @ support + b) [ @ W2 if fuse_w2 ], reduction over k."""

    def kernel(adj_ref, s_ref, b_ref, *rest):
        if fuse_w2:
            w2_ref, o_ref, acc_ref = rest
        else:
            o_ref, acc_ref = rest
        k = pl.program_id(1)

        if support_resident:
            off = pl.multiple_of(k * tk, tk)
            s_blk = s_ref[pl.ds(off, tk), :]
        else:
            s_blk = s_ref[...]

        part = jnp.dot(adj_ref[...], s_blk, preferred_element_type=jnp.float32)

        @pl.when(k == 0)
        def _():
            acc_ref[...] = part

        @pl.when(k > 0)
        def _():
            acc_ref[...] += part

        # Bias + relu (+ fused next-layer x@W2) only once, after the reduction.
        @pl.when(k == pl.num_programs(1) - 1)
        def _():
            act = jnp.maximum(acc_ref[...] + b_ref[...], 0.0)
            if fuse_w2:
                o_ref[...] = jnp.dot(
                    act.astype(w2_ref.dtype), w2_ref[...],
                    preferred_element_type=jnp.float32).astype(o_ref.dtype)
            else:
                o_ref[...] = act.astype(o_ref.dtype)

    return kernel


# ---------------------------------------------------------------------------
# pallas_call wrappers
# ---------------------------------------------------------------------------
def _fused_small(x_p, adj_p, w1_p, b1_p, w2_p, b2_p):
    n_pad, h_pad = x_p.shape
    f_pad = w2_p.shape[1]
    in_bytes = (x_p.size + adj_p.size + w1_p.size + w2_p.size) * 2 \
        + (b1_p.size + b2_p.size) * 4
    cost = pl.CostEstimate(
        flops=2 * n_pad * (h_pad * h_pad + n_pad * h_pad
                           + h_pad * f_pad + n_pad * f_pad),
        transcendentals=0,
        bytes_accessed=int(in_bytes + n_pad * f_pad * 4))
    vmem_need = in_bytes * 2 + 4 * n_pad * (2 * h_pad + 2 * f_pad)  # rough
    return pl.pallas_call(
        _fused_small_kernel,
        out_shape=jax.ShapeDtypeStruct((n_pad, f_pad), jnp.float32),
        grid_spec=pltpu.PrefetchScalarGridSpec(
            num_scalar_prefetch=0,
            grid=(1,),
            in_specs=[
                pl.BlockSpec((n_pad, h_pad), lambda i: (0, 0)),
                pl.BlockSpec((n_pad, n_pad), lambda i: (0, 0)),
                pl.BlockSpec((h_pad, h_pad), lambda i: (0, 0)),
                pl.BlockSpec((1, h_pad), lambda i: (0, 0)),
                pl.BlockSpec((h_pad, f_pad), lambda i: (0, 0)),
                pl.BlockSpec((1, f_pad), lambda i: (0, 0)),
            ],
            out_specs=pl.BlockSpec((n_pad, f_pad), lambda i: (0, 0)),
        ),
        compiler_params=pltpu.CompilerParams(
            dimension_semantics=("arbitrary",),
            vmem_limit_bytes=_vmem_limit(vmem_need)),
        cost_estimate=cost,
    )(x_p, adj_p, w1_p, b1_p, w2_p, b2_p)


def _support(x_pad, w_pad, tm):
    """(Np, Kp) @ (Kp, Op) -> (Np, Op) bf16, tiled over rows (large row tile)."""
    n_pad, kp = x_pad.shape
    op = w_pad.shape[1]
    cost = pl.CostEstimate(
        flops=2 * n_pad * kp * op,
        transcendentals=0,
        bytes_accessed=int(x_pad.size * 2 + w_pad.size * 2 + n_pad * op * 2))
    vmem_need = 2 * tm * kp * 2 + 2 * kp * op * 2 + 2 * tm * op * 2
    return pl.pallas_call(
        _support_kernel,
        out_shape=jax.ShapeDtypeStruct((n_pad, op), jnp.bfloat16),
        grid_spec=pltpu.PrefetchScalarGridSpec(
            num_scalar_prefetch=0,
            grid=(n_pad // tm,),
            in_specs=[
                pl.BlockSpec((tm, kp), lambda i: (i, 0)),
                pl.BlockSpec((kp, op), lambda i: (0, 0)),
            ],
            out_specs=pl.BlockSpec((tm, op), lambda i: (i, 0)),
        ),
        compiler_params=pltpu.CompilerParams(
            dimension_semantics=("parallel",),
            vmem_limit_bytes=_vmem_limit(vmem_need)),
        cost_estimate=cost,
    )(x_pad, w_pad)


def _aggregate(adj_pad, s_pad, b_pad, *, tm, tk, out_dtype, w2_pad=None,
               support_resident=True):
    """relu(adj @ support + b) [ @ W2 ], tiled (row, reduction) grid."""
    n_pad = adj_pad.shape[0]
    op = s_pad.shape[1]
    fuse_w2 = w2_pad is not None
    f_out = w2_pad.shape[1] if fuse_w2 else op
    out_itemsize = jnp.dtype(out_dtype).itemsize

    if support_resident:
        # Full support array resident in VMEM, sliced in-kernel: no re-fetch.
        s_spec = pl.BlockSpec((n_pad, op), lambda i, k: (0, 0))
        s_bytes = n_pad * op * 2
        s_vmem = 2 * n_pad * op * 2
    else:
        s_spec = pl.BlockSpec((tk, op), lambda i, k: (k, 0))
        s_bytes = (n_pad // tm) * n_pad * op * 2   # re-fetched per row tile
        s_vmem = 2 * tk * op * 2

    in_specs = [
        pl.BlockSpec((tm, tk), lambda i, k: (i, k)),   # adj row/col tile
        s_spec,                                        # support
        pl.BlockSpec((1, op), lambda i, k: (0, 0)),    # bias (resident)
    ]
    args = [adj_pad, s_pad, b_pad]
    if fuse_w2:
        in_specs.append(pl.BlockSpec((op, f_out), lambda i, k: (0, 0)))
        args.append(w2_pad)

    out_bytes = n_pad * f_out * out_itemsize
    flops = 2 * n_pad * n_pad * op + (2 * n_pad * op * f_out if fuse_w2 else 0)
    cost = pl.CostEstimate(
        flops=flops, transcendentals=0,
        bytes_accessed=int(adj_pad.size * 2 + s_bytes + b_pad.size * 4
                           + (w2_pad.size * 2 if fuse_w2 else 0) + out_bytes))

    vmem_need = (2 * tm * tk * 2 + s_vmem + 2 * op * 4
                 + (2 * op * f_out * 2 if fuse_w2 else 0)
                 + 2 * tm * f_out * out_itemsize + tm * op * 4)

    return pl.pallas_call(
        _make_aggregate_kernel(tk, support_resident, fuse_w2),
        out_shape=jax.ShapeDtypeStruct((n_pad, f_out), out_dtype),
        grid_spec=pltpu.PrefetchScalarGridSpec(
            num_scalar_prefetch=0,
            grid=(n_pad // tm, n_pad // tk),
            in_specs=in_specs,
            out_specs=pl.BlockSpec((tm, f_out), lambda i, k: (i, 0)),
            scratch_shapes=[pltpu.VMEM((tm, op), jnp.float32)],
        ),
        compiler_params=pltpu.CompilerParams(
            dimension_semantics=("parallel", "arbitrary"),
            vmem_limit_bytes=_vmem_limit(vmem_need)),
        cost_estimate=cost,
    )(*args)


# ---------------------------------------------------------------------------
# Module wrapper
# ---------------------------------------------------------------------------
def attribute_decoder(x, adj, w1, b1, w2, b2, *, force_tiled=False):
    """relu(adj @ (relu(adj @ (x @ W1) + b1) @ W2) + b2), f32 output (N, nfeat)."""
    n, nhid = x.shape
    nfeat = w2.shape[1]

    n_pad = _round_up(n, 128)
    h_pad = _round_up(nhid, 128)
    f_pad = _round_up(nfeat, 128)

    x_p = _pad_to(x, (n_pad, h_pad), jnp.bfloat16)
    adj_p = _pad_to(adj, (n_pad, n_pad), jnp.bfloat16)
    w1_p = _pad_to(w1, (h_pad, h_pad), jnp.bfloat16)
    w2_p = _pad_to(w2, (h_pad, f_pad), jnp.bfloat16)
    b1_p = _pad_to(b1.reshape(1, -1), (1, h_pad), jnp.float32)
    b2_p = _pad_to(b2.reshape(1, -1), (1, f_pad), jnp.float32)

    if n_pad <= 1024 and not force_tiled:
        # Small graph: single fused kernel, adj read from HBM exactly once,
        # no intermediate HBM round trips, one launch.
        out_p = _fused_small(x_p, adj_p, w1_p, b1_p, w2_p, b2_p)
        return out_p[:n, :nfeat]

    # Large graph: tiled path.
    tm = _agg_row_tile(n_pad)          # aggregate row tile (keeps >= 2 tiles)
    tk = tm                            # reduction tile (512-class when possible)
    tm_s = _largest_tile(n_pad)        # big row tile for the x@W streaming matmul

    # gc1: s1 = x @ W1, then fused relu(adj @ s1 + b1) @ W2 -> s2 directly
    # (h never hits HBM; dropout is identity, see TODO at top of file).
    s1 = _support(x_p, w1_p, tm_s)
    resident1 = 2 * n_pad * h_pad * 2 <= (12 << 20)
    s2 = _aggregate(adj_p, s1, b1_p, tm=tm, tk=tk, out_dtype=jnp.bfloat16,
                    w2_pad=w2_p, support_resident=resident1)

    # gc2 aggregation: out = relu(adj @ s2 + b2)
    resident2 = 2 * n_pad * f_pad * 2 <= (12 << 20)
    out_p = _aggregate(adj_p, s2, b2_p, tm=tm, tk=tk, out_dtype=jnp.float32,
                       support_resident=resident2)
    return out_p[:n, :nfeat]


# ---------------------------------------------------------------------------
# Parameter init + references
# ---------------------------------------------------------------------------
def init_gc_params(key, in_features, out_features):
    """GraphConvolution_G.reset_parameters: U(-stdv, stdv), stdv = 1/sqrt(out)."""
    stdv = 1.0 / math.sqrt(out_features)
    kw, kb = jax.random.split(key)
    w = jax.random.uniform(kw, (in_features, out_features), jnp.float32,
                           minval=-stdv, maxval=stdv)
    b = jax.random.uniform(kb, (out_features,), jnp.float32,
                           minval=-stdv, maxval=stdv)
    return w, b


def reference_f32(x, adj, w1, b1, w2, b2):
    h = jnp.maximum(adj @ (x @ w1) + b1, 0.0)
    return jnp.maximum(adj @ (h @ w2) + b2, 0.0)


def reference_bf16(x, adj, w1, b1, w2, b2):
    """Same precision recipe as the kernels: bf16 matmul operands, f32 accumulate."""
    bf = jnp.bfloat16

    def dot(a, b):
        return jnp.dot(a.astype(bf), b.astype(bf),
                       preferred_element_type=jnp.float32)

    h = jnp.maximum(dot(adj, dot(x, w1)) + b1, 0.0)
    return jnp.maximum(dot(adj, dot(h, w2)) + b2, 0.0)


# ---------------------------------------------------------------------------
# Test
# ---------------------------------------------------------------------------
if __name__ == "__main__":
    # Small shapes consistent with the module: N nodes, nhid hidden, nfeat out.
    N, nhid, nfeat = 16, 32, 16

    key = jax.random.PRNGKey(0)
    kx, kadj, k1, k2 = jax.random.split(key, 4)

    x = jax.random.normal(kx, (N, nhid), jnp.float32)
    # Symmetric, row-normalized-ish dense adjacency.
    a = jax.random.uniform(kadj, (N, N), jnp.float32)
    adj = (a + a.T) / (2.0 * N)

    w1, b1 = init_gc_params(k1, nhid, nhid)
    w2, b2 = init_gc_params(k2, nhid, nfeat)

    ref_bf = reference_bf16(x, adj, w1, b1, w2, b2)
    ref_f32 = reference_f32(x, adj, w1, b1, w2, b2)

    # Path 1: fused small-graph kernel (used by default at this size).
    out = jax.block_until_ready(attribute_decoder(x, adj, w1, b1, w2, b2))
    assert out.shape == (N, nfeat)
    assert jnp.allclose(out, ref_bf, atol=2e-3, rtol=2e-3), (
        float(jnp.max(jnp.abs(out - ref_bf))))
    assert jnp.allclose(out, ref_f32, atol=5e-2, rtol=5e-2), (
        float(jnp.max(jnp.abs(out - ref_f32))))

    # Path 2: tiled / fused-epilogue path (forced, to validate the large-graph
    # code path on the same data).
    out_t = jax.block_until_ready(
        attribute_decoder(x, adj, w1, b1, w2, b2, force_tiled=True))
    assert out_t.shape == (N, nfeat)
    assert jnp.allclose(out_t, ref_bf, atol=2e-3, rtol=2e-3), (
        float(jnp.max(jnp.abs(out_t - ref_bf))))
    assert jnp.allclose(out_t, ref_f32, atol=5e-2, rtol=5e-2), (
        float(jnp.max(jnp.abs(out_t - ref_f32))))

    print("KERNEL_OK")
</pallas_src>

<mosaic_0001>
module attributes {stable_mosaic.version = 11 : i64} {
  func.func @_fused_small_kernel(%arg0: i32, %arg1: memref<128x128xbf16, #tpu.memory_space<vmem>>, %arg2: memref<128x128xbf16, #tpu.memory_space<vmem>>, %arg3: memref<128x128xbf16, #tpu.memory_space<vmem>>, %arg4: memref<1x128xf32, #tpu.memory_space<vmem>>, %arg5: memref<128x128xbf16, #tpu.memory_space<vmem>>, %arg6: memref<1x128xf32, #tpu.memory_space<vmem>>, %arg7: memref<128x128xf32, #tpu.memory_space<vmem>>) attributes {dimension_semantics = [#tpu.dimension_semantics<arbitrary>], iteration_bounds = array<i64: 1>, scalar_prefetch = 0 : i64, scratch_operands = 0 : i64, tpu.core_type = #tpu.core_type<tc>, window_params = [{pipeline_mode = #tpu.pipeline_mode<synchronous>, transform_indices = @transform_0, window_bounds = array<i64: 128, 128>}, {pipeline_mode = #tpu.pipeline_mode<synchronous>, transform_indices = @transform_1, window_bounds = array<i64: 128, 128>}, {pipeline_mode = #tpu.pipeline_mode<synchronous>, transform_indices = @transform_2, window_bounds = array<i64: 128, 128>}, {pipeline_mode = #tpu.pipeline_mode<synchronous>, transform_indices = @transform_3, window_bounds = array<i64: 1, 128>}, {pipeline_mode = #tpu.pipeline_mode<synchronous>, transform_indices = @transform_4, window_bounds = array<i64: 128, 128>}, {pipeline_mode = #tpu.pipeline_mode<synchronous>, transform_indices = @transform_5, window_bounds = array<i64: 1, 128>}, {pipeline_mode = #tpu.pipeline_mode<synchronous>, transform_indices = @transform_6, window_bounds = array<i64: 128, 128>}]} {
    %c0 = arith.constant 0 : index
    %c0_0 = arith.constant 0 : index
    %0 = vector.load %arg2[%c0, %c0_0] : memref<128x128xbf16, #tpu.memory_space<vmem>>, vector<128x128xbf16>
    %c0_1 = arith.constant 0 : index
    %c0_2 = arith.constant 0 : index
    %1 = vector.load %arg1[%c0_1, %c0_2] : memref<128x128xbf16, #tpu.memory_space<vmem>>, vector<128x128xbf16>
    %c0_3 = arith.constant 0 : index
    %c0_4 = arith.constant 0 : index
    %2 = vector.load %arg3[%c0_3, %c0_4] : memref<128x128xbf16, #tpu.memory_space<vmem>>, vector<128x128xbf16>
    %cst = arith.constant dense<0.000000e+00> : vector<128x128xf32>
    %3 = tpu.matmul %1, %2, %cst {dimension_numbers = #tpu.dot_dimension_numbers<[1], [0], [0], [1], [0, 0, 1, 1], [], []>} : vector<128x128xbf16>, vector<128x128xbf16>, vector<128x128xf32> -> vector<128x128xf32>
    %4 = arith.truncf %3 : vector<128x128xf32> to vector<128x128xbf16>
    %cst_5 = arith.constant dense<0.000000e+00> : vector<128x128xf32>
    %5 = tpu.matmul %0, %4, %cst_5 {dimension_numbers = #tpu.dot_dimension_numbers<[1], [0], [0], [1], [0, 0, 1, 1], [], []>} : vector<128x128xbf16>, vector<128x128xbf16>, vector<128x128xf32> -> vector<128x128xf32>
    %c0_6 = arith.constant 0 : index
    %c0_7 = arith.constant 0 : index
    %6 = vector.load %arg4[%c0_6, %c0_7] : memref<1x128xf32, #tpu.memory_space<vmem>>, vector<1x128xf32>
    %7 = vector.broadcast %6 : vector<1x128xf32> to vector<128x128xf32>
    %8 = arith.addf %5, %7 : vector<128x128xf32>
    %cst_8 = arith.constant 0.000000e+00 : f32
    %9 = vector.broadcast %cst_8 : f32 to vector<128x128xf32>
    %10 = arith.maximumf %8, %9 : vector<128x128xf32>
    %11 = arith.truncf %10 : vector<128x128xf32> to vector<128x128xbf16>
    %c0_9 = arith.constant 0 : index
    %c0_10 = arith.constant 0 : index
    %12 = vector.load %arg5[%c0_9, %c0_10] : memref<128x128xbf16, #tpu.memory_space<vmem>>, vector<128x128xbf16>
    %cst_11 = arith.constant dense<0.000000e+00> : vector<128x128xf32>
    %13 = tpu.matmul %11, %12, %cst_11 {dimension_numbers = #tpu.dot_dimension_numbers<[1], [0], [0], [1], [0, 0, 1, 1], [], []>} : vector<128x128xbf16>, vector<128x128xbf16>, vector<128x128xf32> -> vector<128x128xf32>
    %14 = arith.truncf %13 : vector<128x128xf32> to vector<128x128xbf16>
    %cst_12 = arith.constant dense<0.000000e+00> : vector<128x128xf32>
    %15 = tpu.matmul %0, %14, %cst_12 {dimension_numbers = #tpu.dot_dimension_numbers<[1], [0], [0], [1], [0, 0, 1, 1], [], []>} : vector<128x128xbf16>, vector<128x128xbf16>, vector<128x128xf32> -> vector<128x128xf32>
    %c0_13 = arith.constant 0 : index
    %c0_14 = arith.constant 0 : index
    %16 = vector.load %arg6[%c0_13, %c0_14] : memref<1x128xf32, #tpu.memory_space<vmem>>, vector<1x128xf32>
    %17 = vector.broadcast %16 : vector<1x128xf32> to vector<128x128xf32>
    %18 = arith.addf %15, %17 : vector<128x128xf32>
    %cst_15 = arith.constant 0.000000e+00 : f32
    %19 = vector.broadcast %cst_15 : f32 to vector<128x128xf32>
    %20 = arith.maximumf %18, %19 : vector<128x128xf32>
    %c0_16 = arith.constant 0 : index
    %c0_17 = arith.constant 0 : index
    %21 = vector.load %arg7[%c0_16, %c0_17] : memref<128x128xf32, #tpu.memory_space<vmem>>, vector<128x128xf32>
    tpu.vector_store %arg7[%c0_16, %c0_17], %20 {strides = array<i32>} : memref<128x128xf32, #tpu.memory_space<vmem>>, vector<128x128xf32>,
    return
  }
  func.func @transform_0(%arg0: i32) -> (i32, i32) {
    %c0_i32 = arith.constant 0 : i32
    %c0_i32_0 = arith.constant 0 : i32
    %c0_i32_1 = arith.constant 0 : i32
    return %c0_i32, %c0_i32_0 : i32, i32
  }
  func.func @transform_1(%arg0: i32) -> (i32, i32) {
    %c0_i32 = arith.constant 0 : i32
    %c0_i32_0 = arith.constant 0 : i32
    %c0_i32_1 = arith.constant 0 : i32
    return %c0_i32, %c0_i32_0 : i32, i32
  }
  func.func @transform_2(%arg0: i32) -> (i32, i32) {
    %c0_i32 = arith.constant 0 : i32
    %c0_i32_0 = arith.constant 0 : i32
    %c0_i32_1 = arith.constant 0 : i32
    return %c0_i32, %c0_i32_0 : i32, i32
  }
  func.func @transform_3(%arg0: i32) -> (i32, i32) {
    %c0_i32 = arith.constant 0 : i32
    %c0_i32_0 = arith.constant 0 : i32
    %c0_i32_1 = arith.constant 0 : i32
    return %c0_i32, %c0_i32_0 : i32, i32
  }
  func.func @transform_4(%arg0: i32) -> (i32, i32) {
    %c0_i32 = arith.constant 0 : i32
    %c0_i32_0 = arith.constant 0 : i32
    %c0_i32_1 = arith.constant 0 : i32
    return %c0_i32, %c0_i32_0 : i32, i32
  }
  func.func @transform_5(%arg0: i32) -> (i32, i32) {
    %c0_i32 = arith.constant 0 : i32
    %c0_i32_0 = arith.constant 0 : i32
    %c0_i32_1 = arith.constant 0 : i32
    return %c0_i32, %c0_i32_0 : i32, i32
  }
  func.func @transform_6(%arg0: i32) -> (i32, i32) {
    %c0_i32 = arith.constant 0 : i32
    %c0_i32_0 = arith.constant 0 : i32
    %c0_i32_1 = arith.constant 0 : i32
    return %c0_i32, %c0_i32_0 : i32, i32
  }
}

</mosaic_0001>

<bundles_post_ra>
// kernel: tpu_custom_call.1
= control target key start
LH: loop header
LB: loop body
LE: loop exit
PB: predicated region body
PF: predicated region fallthrough
CT: control target
= control target key end

     0   :  { %11 = vsyncpa [#allocation3], 0  ;;  %s1331_s0 = inlined_call_operand.hbm [shape: bf16[128,128], index: 0, kind: input, shape index: {}]   ;;  %s1332_s1 = inlined_call_operand.hbm [shape: bf16[128,128], index: 1, kind: input, shape index: {}]   ;;  %s1333_s2 = inlined_call_operand.hbm [shape: bf16[128,128], index: 2, kind: input, shape index: {}]   ;;  %s1334_s3 = inlined_call_operand.vmem [shape: f32[1,128], index: 3, kind: input, shape index: {}]   ;;  %s1335_s4 = inlined_call_operand.hbm [shape: bf16[128,128], index: 4, kind: input, shape index: {}]   ;;  %s1336_s5 = inlined_call_operand.vmem [shape: f32[1,128], index: 5, kind: input, shape index: {}]   ;;  %s1337_s6 = inlined_call_operand.hbm [shape: f32[128,128], index: 6, kind: output, shape index: {}]  }
   0x1   :  { %12 = vsyncpa [#allocation6], 0 }
   0x2   :  { %13 = vsyncpa [#allocation9], 0 }
   0x3   :  { %14 = vsyncpa [#allocation4], 0  ;;  %s1204_s21 = smov [#allocation5]   ;;  %s1205_s23 = smov [#allocation2]  }
   0x4   :  { %s32_s22 = sshll.u32 %s1204_s21, 4  ;;  %s20_s24 = sshll.u32 %s1205_s23, 4  ;;  %s33_s22 = int_to_ptr.vmem [resolvable:$true] %s32_s22  ;;  %s21_s24 = int_to_ptr.vmem [resolvable:$true] %s20_s24 }
   0x5   :  { %s1104_s25 = scalar_lea.vmem %s33_s22, 1024  ;;  %p1109_p1 = scmp.lt.s32.totalorder %s33_s22, %s33_s22 }
   0x6   :  { %p1105_p0 = scmp.ne.s32.totalorder %s33_s22, %s1104_s25  ;;  %p1110_p2 = scmp.lt.s32.totalorder %s1104_s25, %s1104_s25 }
   0x8   :  { %p1111_p3 = por %p1110_p2, %p1109_p1 }
   0xa   :  { %p1112_p4 = pnand %p1111_p3, %p1105_p0 }
   0xc   :  { %1115 = shalt.err (!%p1112_p4)
}
   0xd   :  { %s1206_s26 = smov 64   ;;  %s1207_s27 = smov 4  }
   0xe   :  { %38 = dma.hbm_to_vmem [thread:$0]  %s1332_s1, 1024, %s33_s22, [#allocation6], %s1206_s26, %s1206_s26, %s1207_s27  }
   0xf   :  { %s1124_s30 = scalar_lea.vmem %s21_s24, 1024  ;;  %p1129_p6 = scmp.lt.s32.totalorder %s21_s24, %s21_s24 }
  0x10   :  { %p1125_p5 = scmp.ne.s32.totalorder %s21_s24, %s1124_s30  ;;  %p1130_p7 = scmp.lt.s32.totalorder %s1124_s30, %s1124_s30 }
  0x12   :  { %p1131_p8 = por %p1130_p7, %p1129_p6 }
  0x14   :  { %p1132_p9 = pnand %p1131_p8, %p1125_p5 }
  0x16   :  { %1135 = shalt.err (!%p1132_p9)
}
  0x17   :  { %26 = dma.hbm_to_vmem [thread:$0]  %s1331_s0, 1024, %s21_s24, [#allocation3], %s1206_s26, %s1206_s26, %s1207_s27  }
  0x18   :  { %s1208_s9 = smov [#allocation7]   ;;  %s1209_s11 = smov [#allocation8]  }
  0x19   :  { %s44_s10 = sshll.u32 %s1208_s9, 4  ;;  %s58_s12 = sshll.u32 %s1209_s11, 4  ;;  %s45_s10 = int_to_ptr.vmem [resolvable:$true] %s44_s10  ;;  %s59_s12 = int_to_ptr.vmem [resolvable:$true] %s58_s12 }
  0x1a   :  { %s1144_s1 = scalar_lea.vmem %s45_s10, 1024  ;;  %p1149_p11 = scmp.lt.s32.totalorder %s45_s10, %s45_s10 }
  0x1b   :  { %p1145_p10 = scmp.ne.s32.totalorder %s45_s10, %s1144_s1  ;;  %p1150_p12 = scmp.lt.s32.totalorder %s1144_s1, %s1144_s1 }
  0x1d   :  { %p1151_p13 = por %p1150_p12, %p1149_p11 }
  0x1f   :  { %p1152_p0 = pnand %p1151_p13, %p1145_p10 }
  0x21   :  { %1155 = shalt.err (!%p1152_p0)
}
  0x22   :  { %50 = dma.hbm_to_vmem [thread:$0]  %s1333_s2, 1024, %s45_s10, [#allocation6], %s1206_s26, %s1206_s26, %s1207_s27  }
  0x23   :  { %s1164_s0 = scalar_lea.vmem %s59_s12, 1024  ;;  %p1169_p2 = scmp.lt.s32.totalorder %s59_s12, %s59_s12 }
  0x24   :  { %p1165_p1 = scmp.ne.s32.totalorder %s59_s12, %s1164_s0  ;;  %p1170_p3 = scmp.lt.s32.totalorder %s1164_s0, %s1164_s0 }
  0x26   :  { %p1171_p4 = por %p1170_p3, %p1169_p2 }
  0x28   :  { %p1172_p5 = pnand %p1171_p4, %p1165_p1 }
  0x2a   :  { %1175 = shalt.err (!%p1172_p5)
}
  0x2b   :  { %64 = dma.hbm_to_vmem [thread:$0]  %s1335_s4, 1024, %s59_s12, [#allocation9], %s1206_s26, %s1206_s26, %s1207_s27  }
  0x2c   :  { %1196 = dma.done.wait [#allocation3], 1024  }
  0x2d   :  { %1197 = vsyncadd [#allocation3], 4294966272 }
  0x2e   :  { %1198 = dma.done.wait [#allocation6], 2048  }
  0x2f   :  { %1199 = vsyncadd [#allocation6], 4294965248 }
  0x30   :  { %1200 = dma.done.wait [#allocation9], 1024  }
  0x31   :  { %1201 = vsyncadd [#allocation9], 4294966272  ;;  %v1064_v0 = vld [vmem:[#allocation7 + $0x38] sm:$0xff]   ;;  %v1065_v1 = vld [vmem:[#allocation7 + $0x30] sm:$0xff]  }
  0x32   :  { %927 = vmatprep.subr.bf16.mxu0 %v1064_v0  ;;  %v1066_v2 = vld [vmem:[#allocation7 + $0x28] sm:$0xff]   ;;  %v1067_v3 = vld [vmem:[#allocation7 + $0x20] sm:$0xff]   ;;  %v1068_v5 = vld [vmem:[#allocation7 + $0x18] sm:$0xff]  }
  0x33   :  { %928 = vmatpush3.bf16.msra.mxu0 %v1064_v0  ;;  %v1072_v4 = vld [vmem:[#allocation2] sm:$0xff]   ;;  %v1069_v6 = vld [vmem:[#allocation7 + $0x10] sm:$0xff]   ;;  %v1070_v7 = vld [vmem:[#allocation7 + $0x8] sm:$0xff]  }
  0x34   :  { %929 = vmatprep.subr.bf16.mxu0 %v1065_v1  ;;  %943 = vmatprep.mubr.bf16.mxu0 %v1072_v4  ;;  %v1071_v8 = vld [vmem:[#allocation7] sm:$0xff]   ;;  %v1073_v9 = vld [vmem:[#allocation2 + $0x8] sm:$0xff]   ;;  %v1074_v10 = vld [vmem:[#allocation2 + $0x10] sm:$0xff]  }
  0x35   :  { %v1075_v11 = vld [vmem:[#allocation2 + $0x18] sm:$0xff]   ;;  %v1076_v12 = vld [vmem:[#allocation2 + $0x20] sm:$0xff]   ;;  %v1077_v13 = vld [vmem:[#allocation2 + $0x28] sm:$0xff]  }
  0x36   :  { %v1078_v14 = vld [vmem:[#allocation2 + $0x30] sm:$0xff]   ;;  %v1079_v15 = vld [vmem:[#allocation2 + $0x38] sm:$0xff]   ;;  %v1272_v16 = vld [vmem:[#allocation5] sm:$0xff]  }
  0x37   :  { %930 = vmatpush3.bf16.msra.mxu0 %v1065_v1  ;;  %975 = vmatprep.mubr.bf16.mxu1 %v1272_v16  ;;  %v1088_v17 = vld [vmem:[#allocation8 + $0x38] sm:$0xff]   ;;  %v1089_v18 = vld [vmem:[#allocation8 + $0x30] sm:$0xff]   ;;  %v1090_v19 = vld [vmem:[#allocation8 + $0x28] sm:$0xff]  }
  0x38   :  { %931 = vmatprep.subr.bf16.mxu0 %v1066_v2  ;;  %v1091_v20 = vld [vmem:[#allocation8 + $0x20] sm:$0xff]   ;;  %v1092_v21 = vld [vmem:[#allocation8 + $0x18] sm:$0xff]   ;;  %v1275_v46 = vld [vmem:[#allocation5 + $0x8] sm:$0xff]  }
  0x39   :  { %v1277_v47 = vld [vmem:[#allocation5 + $0x10] sm:$0xff]   ;;  %v1281_v48 = vld [vmem:[#allocation5 + $0x18] sm:$0xff]   ;;  %v1283_v49 = vld [vmem:[#allocation5 + $0x20] sm:$0xff]  }
  0x3a   :  { %v1287_v50 = vld [vmem:[#allocation5 + $0x28] sm:$0xff]   ;;  %v1289_v51 = vld [vmem:[#allocation5 + $0x30] sm:$0xff]   ;;  %v1293_v52 = vld [vmem:[#allocation5 + $0x38] sm:$0xff]  }
  0x3b   :  { %932 = vmatpush3.bf16.msra.mxu0 %v1066_v2  ;;  %v1093_v53 = vld [vmem:[#allocation8 + $0x10] sm:$0xff]   ;;  %v1094_v54 = vld [vmem:[#allocation8 + $0x8] sm:$0xff]   ;;  %v1095_v55 = vld [vmem:[#allocation8] sm:$0xff]  }
  0x3c   :  { %933 = vmatprep.subr.bf16.mxu0 %v1067_v3  ;;  %v845_v58 = vld [vmem:[%s1334_s3] ss:$0 sm:$0xff] }
  0x3f   :  { %934 = vmatpush3.bf16.msra.mxu0 %v1067_v3 }
  0x40   :  { %935 = vmatprep.subr.bf16.mxu0 %v1068_v5 }
  0x43   :  { %936 = vmatpush3.bf16.msra.mxu0 %v1068_v5 }
  0x44   :  { %937 = vmatprep.subr.bf16.mxu0 %v1069_v6 }
  0x47   :  { %938 = vmatpush3.bf16.msra.mxu0 %v1069_v6 }
  0x48   :  { %939 = vmatprep.subr.bf16.mxu0 %v1070_v7 }
  0x4b   :  { %940 = vmatpush3.bf16.msra.mxu0 %v1070_v7 }
  0x4c   :  { %941 = vmatprep.subr.bf16.mxu0 %v1071_v8 }
  0x4f   :  { %942 = vmatpush3.bf16.msra.mxu0 %v1071_v8 }
  0x50   :  { %991 = vmatprep.subr.bf16.mxu0 %v1088_v17 }
  0x52   :  { %944 = vmatmul.mubr.bf16.vlgmr.msra.gmra.mxu0 %v1073_v9 }
  0x53   :  { %947 = vmatprep.mubr.bf16.mxu0 %v1074_v10  ;;  %992 = vmatpush3.bf16.msra.mxu0 %v1088_v17 }
  0x54   :  { %993 = vmatprep.subr.bf16.mxu0 %v1089_v18 }
  0x57   :  { %994 = vmatpush3.bf16.msra.mxu0 %v1089_v18 }
  0x58   :  { %995 = vmatprep.subr.bf16.mxu0 %v1090_v19 }
  0x5a   :  { %948 = vmatmul.mubr.bf16.gmra.mxu0 %v1075_v11 }
  0x5b   :  { %951 = vmatprep.mubr.bf16.mxu0 %v1076_v12  ;;  %996 = vmatpush3.bf16.msra.mxu0 %v1090_v19 }
  0x5c   :  { %997 = vmatprep.subr.bf16.mxu0 %v1091_v20 }
  0x5f   :  { %998 = vmatpush3.bf16.msra.mxu0 %v1091_v20 }
  0x60   :  { %999 = vmatprep.subr.bf16.mxu0 %v1092_v21 }
  0x62   :  { %952 = vmatmul.mubr.bf16.gmra.mxu0 %v1077_v13 }
  0x63   :  { %955 = vmatprep.mubr.bf16.mxu0 %v1078_v14  ;;  %1000 = vmatpush3.bf16.msra.mxu0 %v1092_v21 }
  0x64   :  { %1001 = vmatprep.subr.bf16.mxu0 %v1093_v53 }
  0x67   :  { %1002 = vmatpush3.bf16.msra.mxu0 %v1093_v53 }
  0x68   :  { %1003 = vmatprep.subr.bf16.mxu0 %v1094_v54 }
  0x6a   :  { %956 = vmatmul.mubr.bf16.gmra.mxu0 %v1079_v15 }
  0x6b   :  { %1004 = vmatpush3.bf16.msra.mxu0 %v1094_v54 }
  0x6c   :  { %1005 = vmatprep.subr.bf16.mxu0 %v1095_v55 }
  0x6f   :  { %1006 = vmatpush3.bf16.msra.mxu0 %v1095_v55 }
 0x112   :  { %v945_v22 = vpop.f32.mrf.mxu0 }
 0x114   :  { %v258_v23 = vpop.f32.mrf.mxu0 }
 0x116   :  { %v946_v24 = vpop.f32.mrf.mxu0 }
 0x117   :  { %v322_v44 = vpack.c.bf16 %v946_v24, %v945_v22 }
 0x118   :  { %v261_v25 = vpop.f32.mrf.mxu0 }
 0x119   :  { %v321_v45 = vpack.c.bf16 %v261_v25, %v258_v23 }
 0x11a   :  { %v949_v26 = vpop.f32.mrf.mxu0 }
 0x11c   :  { %v274_v27 = vpop.f32.mrf.mxu0 }
 0x11e   :  { %v950_v28 = vpop.f32.mrf.mxu0 }
 0x11f   :  { %v324_v42 = vpack.c.bf16 %v950_v28, %v949_v26 }
 0x120   :  { %v277_v29 = vpop.f32.mrf.mxu0 }
 0x121   :  { %v323_v43 = vpack.c.bf16 %v277_v29, %v274_v27 }
 0x122   :  { %v953_v30 = vpop.f32.mrf.mxu0 }
 0x124   :  { %v290_v31 = vpop.f32.mrf.mxu0 }
 0x126   :  { %v954_v32 = vpop.f32.mrf.mxu0 }
 0x127   :  { %v326_v40 = vpack.c.bf16 %v954_v32, %v953_v30 }
 0x128   :  { %v293_v33 = vpop.f32.mrf.mxu0 }
 0x129   :  { %v325_v41 = vpack.c.bf16 %v293_v33, %v290_v31 }
 0x12a   :  { %v957_v34 = vpop.f32.mrf.mxu0 }
 0x12c   :  { %v306_v35 = vpop.f32.mrf.mxu0 }
 0x12e   :  { %v958_v36 = vpop.f32.mrf.mxu0 }
 0x12f   :  { %v328_v37 = vpack.c.bf16 %v958_v36, %v957_v34 }
 0x130   :  { %v309_v38 = vpop.f32.mrf.mxu0 }
 0x131   :  { %v327_v39 = vpack.c.bf16 %v309_v38, %v306_v35  ;;  %959 = vmatprep.subr.bf16.mxu1 %v328_v37 }
 0x132   :  { %960 = vmatpush3.bf16.msra.mxu1 %v328_v37 }
 0x133   :  { %961 = vmatprep.subr.bf16.mxu1 %v327_v39 }
 0x136   :  { %962 = vmatpush3.bf16.msra.mxu1 %v327_v39 }
 0x137   :  { %963 = vmatprep.subr.bf16.mxu1 %v326_v40 }
 0x13a   :  { %964 = vmatpush3.bf16.msra.mxu1 %v326_v40 }
 0x13b   :  { %965 = vmatprep.subr.bf16.mxu1 %v325_v41 }
 0x13e   :  { %966 = vmatpush3.bf16.msra.mxu1 %v325_v41 }
 0x13f   :  { %967 = vmatprep.subr.bf16.mxu1 %v324_v42 }
 0x142   :  { %968 = vmatpush3.bf16.msra.mxu1 %v324_v42 }
 0x143   :  { %969 = vmatprep.subr.bf16.mxu1 %v323_v43 }
 0x146   :  { %970 = vmatpush3.bf16.msra.mxu1 %v323_v43 }
 0x147   :  { %971 = vmatprep.subr.bf16.mxu1 %v322_v44 }
 0x14a   :  { %972 = vmatpush3.bf16.msra.mxu1 %v322_v44 }
 0x14b   :  { %973 = vmatprep.subr.bf16.mxu1 %v321_v45 }
 0x14e   :  { %974 = vmatpush3.bf16.msra.mxu1 %v321_v45 }
 0x151   :  { %976 = vmatmul.mubr.bf16.vlgmr.msra.gmra.mxu1 %v1275_v46 }
 0x152   :  { %979 = vmatprep.mubr.bf16.mxu1 %v1277_v47 }
 0x159   :  { %980 = vmatmul.mubr.bf16.gmra.mxu1 %v1281_v48 }
 0x15a   :  { %983 = vmatprep.mubr.bf16.mxu1 %v1283_v49 }
 0x161   :  { %984 = vmatmul.mubr.bf16.gmra.mxu1 %v1287_v50 }
 0x162   :  { %987 = vmatprep.mubr.bf16.mxu1 %v1289_v51 }
 0x169   :  { %988 = vmatmul.mubr.bf16.gmra.mxu1 %v1293_v52 }
 0x16a   :  { %1039 = vmatprep.mubr.bf16.mxu1 %v1272_v16 }
 0x211   :  { %v977_v56 = vpop.f32.mrf.mxu1 }
 0x212   :  { %v427_v62 = vadd.f32 %v977_v56, %v845_v58 }
 0x213   :  { %v418_v57 = vpop.f32.mrf.mxu1 }
 0x214   :  { %v419_v60 = vadd.f32 %v845_v58, %v418_v57  ;;  %v483_v5 = vmax.f32 %v427_v62, 0.0 }
 0x215   :  { %v978_v59 = vpop.f32.mrf.mxu1 }
 0x216   :  { %v430_v61 = vadd.f32 %v978_v59, %v845_v58  ;;  %v481_v3 = vmax.f32 %v419_v60, 0.0 }
 0x217   :  { %v421_v63 = vpop.f32.mrf.mxu1 }
 0x218   :  { %v422_v0 = vadd.f32 %v845_v58, %v421_v63  ;;  %v484_v1 = vmax.f32 %v430_v61, 0.0 }
 0x219   :  { %v981_v2 = vpop.f32.mrf.mxu1 }
 0x21a   :  { %v482_v4 = vmax.f32 %v422_v0, 0.0  ;;  %v498_v8 = vpack.c.bf16 %v484_v1, %v483_v5  ;;  %v443_v12 = vadd.f32 %v981_v2, %v845_v58 }
 0x21b   :  { %v434_v6 = vpop.f32.mrf.mxu1 }
 0x21c   :  { %v497_v7 = vpack.c.bf16 %v482_v4, %v481_v3  ;;  %v435_v10 = vadd.f32 %v845_v58, %v434_v6  ;;  %v487_v19 = vmax.f32 %v443_v12, 0.0 }
 0x21d   :  { %v982_v9 = vpop.f32.mrf.mxu1 }
 0x21e   :  { %v446_v11 = vadd.f32 %v982_v9, %v845_v58  ;;  %1007 = vmatprep.mubr.bf16.mxu0 %v497_v7  ;;  %v485_v17 = vmax.f32 %v435_v10, 0.0 }
 0x21f   :  { %v437_v13 = vpop.f32.mrf.mxu1  ;;  %1008 = vmatmul.mubr.bf16.vlgmr.msra.gmra.mxu0 %v498_v8 }
 0x220   :  { %v438_v14 = vadd.f32 %v845_v58, %v437_v13  ;;  %v488_v15 = vmax.f32 %v446_v11, 0.0 }
 0x221   :  { %v985_v16 = vpop.f32.mrf.mxu1 }
 0x222   :  { %v486_v18 = vmax.f32 %v438_v14, 0.0  ;;  %v500_v22 = vpack.c.bf16 %v488_v15, %v487_v19  ;;  %v459_v26 = vadd.f32 %v985_v16, %v845_v58  ;;  %v1310_v16 = vld [vmem:[%s1336_s5] ss:$0 sm:$0xff]  ;;  %s1210_s5 = smov [#allocation10]  }
 0x223   :  { %v450_v20 = vpop.f32.mrf.mxu1  ;;  %s815_s18 = sshll.u32 %s1210_s5, 4  ;;  %s816_s18 = int_to_ptr.vmem [resolvable:$true] %s815_s18 }
 0x224   :  { %v499_v21 = vpack.c.bf16 %v486_v18, %v485_v17  ;;  %v451_v24 = vadd.f32 %v845_v58, %v450_v20  ;;  %v491_v33 = vmax.f32 %v459_v26, 0.0  ;;  %s1176_s19 = scalar_lea.vmem %s816_s18, 2048  ;;  %p1181_p7 = scmp.lt.s32.totalorder %s816_s18, %s816_s18 }
 0x225   :  { %v986_v23 = vpop.f32.mrf.mxu1  ;;  %p1177_p6 = scmp.ne.s32.totalorder %s816_s18, %s1176_s19  ;;  %p1182_p8 = scmp.lt.s32.totalorder %s1176_s19, %s1176_s19 }
 0x226   :  { %v462_v25 = vadd.f32 %v986_v23, %v845_v58  ;;  %1011 = vmatprep.mubr.bf16.mxu0 %v499_v21  ;;  %v489_v31 = vmax.f32 %v451_v24, 0.0 }
 0x227   :  { %v453_v27 = vpop.f32.mrf.mxu1  ;;  %1012 = vmatmul.mubr.bf16.gmra.mxu0 %v500_v22  ;;  %p1183_p9 = por %p1182_p8, %p1181_p7 }
 0x228   :  { %v454_v28 = vadd.f32 %v845_v58, %v453_v27  ;;  %v492_v29 = vmax.f32 %v462_v25, 0.0 }
 0x229   :  { %v989_v30 = vpop.f32.mrf.mxu1  ;;  %p1184_p10 = pnand %p1183_p9, %p1177_p6 }
 0x22a   :  { %v490_v32 = vmax.f32 %v454_v28, 0.0  ;;  %v502_v36 = vpack.c.bf16 %v492_v29, %v491_v33  ;;  %v475_v40 = vadd.f32 %v989_v30, %v845_v58 }
 0x22b   :  { %v466_v34 = vpop.f32.mrf.mxu1 }
 0x22c   :  { %v501_v35 = vpack.c.bf16 %v490_v32, %v489_v31  ;;  %v467_v38 = vadd.f32 %v845_v58, %v466_v34  ;;  %v495_v53 = vmax.f32 %v475_v40, 0.0 }
 0x22d   :  { %v990_v37 = vpop.f32.mrf.mxu1 }
 0x22e   :  { %v478_v39 = vadd.f32 %v990_v37, %v845_v58  ;;  %1015 = vmatprep.mubr.bf16.mxu0 %v501_v35  ;;  %v493_v44 = vmax.f32 %v467_v38, 0.0 }
 0x22f   :  { %v469_v41 = vpop.f32.mrf.mxu1  ;;  %1016 = vmatmul.mubr.bf16.gmra.mxu0 %v502_v36 }
 0x230   :  { %v470_v42 = vadd.f32 %v845_v58, %v469_v41  ;;  %v496_v43 = vmax.f32 %v478_v39, 0.0 }
 0x232   :  { %v494_v45 = vmax.f32 %v470_v42, 0.0  ;;  %v504_v55 = vpack.c.bf16 %v496_v43, %v495_v53 }
 0x234   :  { %v503_v54 = vpack.c.bf16 %v494_v45, %v493_v44 }
 0x236   :  { %1019 = vmatprep.mubr.bf16.mxu0 %v503_v54 }
 0x237   :  { %1020 = vmatmul.mubr.bf16.gmra.mxu0 %v504_v55 }
 0x2df   :  { %v1009_v56 = vpop.f32.mrf.mxu0 }
 0x2e1   :  { %v603_v57 = vpop.f32.mrf.mxu0 }
 0x2e3   :  { %v1010_v59 = vpop.f32.mrf.mxu0 }
 0x2e4   :  { %v667_v14 = vpack.c.bf16 %v1010_v59, %v1009_v56 }
 0x2e5   :  { %v606_v60 = vpop.f32.mrf.mxu0 }
 0x2e6   :  { %v666_v15 = vpack.c.bf16 %v606_v60, %v603_v57 }
 0x2e7   :  { %v1013_v61 = vpop.f32.mrf.mxu0 }
 0x2e9   :  { %v619_v62 = vpop.f32.mrf.mxu0 }
 0x2eb   :  { %v1014_v63 = vpop.f32.mrf.mxu0 }
 0x2ec   :  { %v669_v12 = vpack.c.bf16 %v1014_v63, %v1013_v61 }
 0x2ed   :  { %v622_v0 = vpop.f32.mrf.mxu0 }
 0x2ee   :  { %v668_v13 = vpack.c.bf16 %v622_v0, %v619_v62 }
 0x2ef   :  { %v1017_v1 = vpop.f32.mrf.mxu0 }
 0x2f1   :  { %v635_v2 = vpop.f32.mrf.mxu0 }
 0x2f3   :  { %v1018_v3 = vpop.f32.mrf.mxu0 }
 0x2f4   :  { %v671_v10 = vpack.c.bf16 %v1018_v3, %v1017_v1 }
 0x2f5   :  { %v638_v58 = vpop.f32.mrf.mxu0 }
 0x2f6   :  { %v670_v11 = vpack.c.bf16 %v638_v58, %v635_v2 }
 0x2f7   :  { %v1021_v4 = vpop.f32.mrf.mxu0 }
 0x2f9   :  { %v651_v5 = vpop.f32.mrf.mxu0 }
 0x2fb   :  { %v1022_v6 = vpop.f32.mrf.mxu0 }
 0x2fc   :  { %v673_v7 = vpack.c.bf16 %v1022_v6, %v1021_v4 }
 0x2fd   :  { %v654_v8 = vpop.f32.mrf.mxu0 }
 0x2fe   :  { %v672_v9 = vpack.c.bf16 %v654_v8, %v651_v5  ;;  %1023 = vmatprep.subr.bf16.mxu1 %v673_v7 }
 0x2ff   :  { %1024 = vmatpush3.bf16.msra.mxu1 %v673_v7 }
 0x300   :  { %1025 = vmatprep.subr.bf16.mxu1 %v672_v9 }
 0x303   :  { %1026 = vmatpush3.bf16.msra.mxu1 %v672_v9 }
 0x304   :  { %1027 = vmatprep.subr.bf16.mxu1 %v671_v10 }
 0x307   :  { %1028 = vmatpush3.bf16.msra.mxu1 %v671_v10 }
 0x308   :  { %1029 = vmatprep.subr.bf16.mxu1 %v670_v11 }
 0x30b   :  { %1030 = vmatpush3.bf16.msra.mxu1 %v670_v11 }
 0x30c   :  { %1031 = vmatprep.subr.bf16.mxu1 %v669_v12 }
 0x30f   :  { %1032 = vmatpush3.bf16.msra.mxu1 %v669_v12 }
 0x310   :  { %1033 = vmatprep.subr.bf16.mxu1 %v668_v13 }
 0x313   :  { %1034 = vmatpush3.bf16.msra.mxu1 %v668_v13 }
 0x314   :  { %1035 = vmatprep.subr.bf16.mxu1 %v667_v14 }
 0x317   :  { %1036 = vmatpush3.bf16.msra.mxu1 %v667_v14 }
 0x318   :  { %1037 = vmatprep.subr.bf16.mxu1 %v666_v15 }
 0x31b   :  { %1038 = vmatpush3.bf16.msra.mxu1 %v666_v15 }
 0x31e   :  { %1040 = vmatmul.mubr.bf16.vlgmr.msra.gmra.mxu1 %v1275_v46 }
 0x31f   :  { %1043 = vmatprep.mubr.bf16.mxu1 %v1277_v47 }
 0x326   :  { %1044 = vmatmul.mubr.bf16.gmra.mxu1 %v1281_v48 }
 0x327   :  { %1047 = vmatprep.mubr.bf16.mxu1 %v1283_v49 }
 0x32e   :  { %1048 = vmatmul.mubr.bf16.gmra.mxu1 %v1287_v50 }
 0x32f   :  { %1051 = vmatprep.mubr.bf16.mxu1 %v1289_v51 }
 0x336   :  { %1052 = vmatmul.mubr.bf16.gmra.mxu1 %v1293_v52 }
 0x3de   :  { %v1041_v17 = vpop.f32.mrf.mxu1 }
 0x3df   :  { %v724_v46 = vadd.f32 %v1041_v17, %v1310_v16 }
 0x3e0   :  { %v715_v18 = vpop.f32.mrf.mxu1 }
 0x3e1   :  { %v780_v47 = vmax.f32 %v724_v46, 0.0  ;;  %v716_v48 = vadd.f32 %v1310_v16, %v715_v18 }
 0x3e2   :  { %v1042_v19 = vpop.f32.mrf.mxu1 }
 0x3e3   :  { %796 = vst [vmem:[#allocation10 + $0x10] sm:$0xff] %v780_v47  ;;  %v778_v49 = vmax.f32 %v716_v48, 0.0  ;;  %v727_v50 = vadd.f32 %v1042_v19, %v1310_v16 }
 0x3e4   :  { %v718_v51 = vpop.f32.mrf.mxu1 }
 0x3e5   :  { %794 = vst [vmem:[#allocation10] sm:$0xff] %v778_v49  ;;  %v781_v52 = vmax.f32 %v727_v50, 0.0  ;;  %v719_v20 = vadd.f32 %v1310_v16, %v718_v51 }
 0x3e6   :  { %v1045_v21 = vpop.f32.mrf.mxu1 }
 0x3e7   :  { %797 = vst [vmem:[#allocation10 + $0x18] sm:$0xff] %v781_v52  ;;  %v779_v22 = vmax.f32 %v719_v20, 0.0  ;;  %v740_v23 = vadd.f32 %v1045_v21, %v1310_v16 }
 0x3e8   :  { %v731_v24 = vpop.f32.mrf.mxu1 }
 0x3e9   :  { %795 = vst [vmem:[#allocation10 + $0x8] sm:$0xff] %v779_v22  ;;  %v784_v25 = vmax.f32 %v740_v23, 0.0  ;;  %v732_v26 = vadd.f32 %v1310_v16, %v731_v24 }
 0x3ea   :  { %v1046_v27 = vpop.f32.mrf.mxu1 }
 0x3eb   :  { %800 = vst [vmem:[#allocation10 + $0x30] sm:$0xff] %v784_v25  ;;  %v782_v28 = vmax.f32 %v732_v26, 0.0  ;;  %v743_v29 = vadd.f32 %v1046_v27, %v1310_v16 }
 0x3ec   :  { %v734_v30 = vpop.f32.mrf.mxu1 }
 0x3ed   :  { %798 = vst [vmem:[#allocation10 + $0x20] sm:$0xff] %v782_v28  ;;  %v785_v31 = vmax.f32 %v743_v29, 0.0  ;;  %v735_v32 = vadd.f32 %v1310_v16, %v734_v30 }
 0x3ee   :  { %v1049_v33 = vpop.f32.mrf.mxu1 }
 0x3ef   :  { %801 = vst [vmem:[#allocation10 + $0x38] sm:$0xff] %v785_v31  ;;  %v783_v34 = vmax.f32 %v735_v32, 0.0  ;;  %v756_v35 = vadd.f32 %v1049_v33, %v1310_v16 }
 0x3f0   :  { %v747_v36 = vpop.f32.mrf.mxu1 }
 0x3f1   :  { %799 = vst [vmem:[#allocation10 + $0x28] sm:$0xff] %v783_v34  ;;  %v788_v37 = vmax.f32 %v756_v35, 0.0  ;;  %v748_v38 = vadd.f32 %v1310_v16, %v747_v36 }
 0x3f2   :  { %v1050_v39 = vpop.f32.mrf.mxu1 }
 0x3f3   :  { %804 = vst [vmem:[#allocation10 + $0x50] sm:$0xff] %v788_v37  ;;  %v786_v40 = vmax.f32 %v748_v38, 0.0  ;;  %v759_v41 = vadd.f32 %v1050_v39, %v1310_v16 }
 0x3f4   :  { %v750_v42 = vpop.f32.mrf.mxu1 }
 0x3f5   :  { %802 = vst [vmem:[#allocation10 + $0x40] sm:$0xff] %v786_v40  ;;  %v789_v43 = vmax.f32 %v759_v41, 0.0  ;;  %v751_v44 = vadd.f32 %v1310_v16, %v750_v42 }
 0x3f6   :  { %v1053_v45 = vpop.f32.mrf.mxu1 }
 0x3f7   :  { %805 = vst [vmem:[#allocation10 + $0x58] sm:$0xff] %v789_v43  ;;  %v787_v53 = vmax.f32 %v751_v44, 0.0  ;;  %v772_v54 = vadd.f32 %v1053_v45, %v1310_v16 }
 0x3f8   :  { %v763_v55 = vpop.f32.mrf.mxu1 }
 0x3f9   :  { %803 = vst [vmem:[#allocation10 + $0x48] sm:$0xff] %v787_v53  ;;  %v792_v56 = vmax.f32 %v772_v54, 0.0  ;;  %v764_v57 = vadd.f32 %v1310_v16, %v763_v55 }
 0x3fa   :  { %v1054_v59 = vpop.f32.mrf.mxu1 }
 0x3fb   :  { %808 = vst [vmem:[#allocation10 + $0x70] sm:$0xff] %v792_v56  ;;  %v790_v60 = vmax.f32 %v764_v57, 0.0  ;;  %v775_v61 = vadd.f32 %v1054_v59, %v1310_v16 }
 0x3fc   :  { %v766_v62 = vpop.f32.mrf.mxu1 }
 0x3fd   :  { %806 = vst [vmem:[#allocation10 + $0x60] sm:$0xff] %v790_v60  ;;  %v793_v63 = vmax.f32 %v775_v61, 0.0  ;;  %v767_v0 = vadd.f32 %v1310_v16, %v766_v62 }
 0x3ff   :  { %809 = vst [vmem:[#allocation10 + $0x78] sm:$0xff] %v793_v63  ;;  %v791_v1 = vmax.f32 %v767_v0, 0.0 }
 0x401   :  { %807 = vst [vmem:[#allocation10 + $0x68] sm:$0xff] %v791_v1 }
 0x402   :  { %1187 = shalt.err (!%p1184_p10)
}
 0x403   :  { %s1211_s20 = smov 128   ;;  %s1212_s21 = smov 8  }
 0x404   :  { %821 = dma.vmem_to_hbm [thread:$0]  %s816_s18, 2048, %s1337_s6, [#allocation4], %s1211_s20, %s1211_s20, %s1212_s21  }
 0x405   :  { %1202 = dma.done.wait [#allocation4], 2048  }
 0x406   :  { %1203 = vsyncadd [#allocation4], 4294965248 }
 0x407   :  { %825 = vsyncpa [#allocation3], 1 }
 0x408   :  { %826 = vsyncpa [#allocation6], 1 }
 0x409   :  { %827 = vsyncpa [#allocation9], 1 }
 0x40a   :  { %828 = vsyncpa [#allocation4], 1 }

</bundles_post_ra>
